<compile_context>
chip_gen: v7x
topology: tpu7x:2x2x1
jax: 0.10.0
libtpu: 0.0.40
codegen_flags: <defaults>
</compile_context>

<pallas_src>
import functools

import jax
import jax.numpy as jnp
from jax import lax
from jax.experimental import pallas as pl
from jax.experimental.pallas import tpu as pltpu

D_IN, H1, H2, D_OUT = 784, 300, 100, 10

# Contract dim 1 of the activations with dim 1 of the (out, in) weight, i.e. x @ W.T,
# without any host-side transpose (the MXU consumes the transposed operand for free).
_DOT_T = (((1,), (1,)), ((), ()))


def lenet_kernel(x_ref, w1_ref, w2_ref, w3_ref, o_ref):
    # x_ref:  (TILE_B, 784) bf16
    # w1_ref: (300, 784) bf16   w2_ref: (100, 300) bf16   w3_ref: (10, 100) bf16
    x = x_ref[...]

    # fc1 + relu: bf16 MXU inputs, f32 accumulation, f32 elementwise.
    h1 = lax.dot_general(x, w1_ref[...], _DOT_T, preferred_element_type=jnp.float32)
    h1 = jnp.maximum(h1, 0.0)

    # fc2 + relu (downcast activations to bf16 only at the matmul input).
    h2 = lax.dot_general(h1.astype(jnp.bfloat16), w2_ref[...], _DOT_T,
                         preferred_element_type=jnp.float32)
    h2 = jnp.maximum(h2, 0.0)

    # fc3
    logits = lax.dot_general(h2.astype(jnp.bfloat16), w3_ref[...], _DOT_T,
                             preferred_element_type=jnp.float32)

    # log_softmax over dim=1 (last axis), numerically stable, in f32.
    m = jnp.max(logits, axis=-1, keepdims=True)
    shifted = logits - m
    lse = jnp.log(jnp.sum(jnp.exp(shifted), axis=-1, keepdims=True))
    o_ref[...] = (shifted - lse).astype(o_ref.dtype)


@functools.partial(jax.jit, static_argnames=("tile_b",))
def lenet_forward(x, w1, w2, w3, tile_b=256):
    """x: any shape flattening to (B, 784); w*: PyTorch-convention (out, in) weights."""
    xb = x.reshape(-1, D_IN)                  # glue: same as x.view(-1, 784)
    B = xb.shape[0]
    tb = min(tile_b, B)                       # small demo batches -> single full block
    grid_b = pl.cdiv(B, tb)

    # bf16 operands at the pallas_call boundary; accumulation stays f32 in-kernel.
    xb = xb.astype(jnp.bfloat16)
    w1b = w1.astype(jnp.bfloat16)
    w2b = w2.astype(jnp.bfloat16)
    w3b = w3.astype(jnp.bfloat16)

    return pl.pallas_call(
        lenet_kernel,
        out_shape=jax.ShapeDtypeStruct((B, D_OUT), jnp.float32),
        grid=(grid_b,),
        in_specs=[
            pl.BlockSpec((tb, D_IN), lambda i: (i, 0)),     # batch-tiled, pipelined
            pl.BlockSpec((H1, D_IN), lambda i: (0, 0)),     # full weights, resident
            pl.BlockSpec((H2, H1), lambda i: (0, 0)),
            pl.BlockSpec((D_OUT, H2), lambda i: (0, 0)),
        ],
        out_specs=pl.BlockSpec((tb, D_OUT), lambda i: (i, 0)),
        compiler_params=pltpu.CompilerParams(
            # Batch tiles are independent -> shard across both TCs on v7x; no-op on
            # single-TC v5e/v6e.
            dimension_semantics=("parallel",),
        ),
    )(xb, w1b, w2b, w3b)


if __name__ == "__main__":
    key = jax.random.PRNGKey(0)
    kx, k1, k2, k3 = jax.random.split(key, 4)

    # Small MNIST-like batch: (B, 1, 28, 28) NCHW, flattened to (B, 784) in the wrapper.
    B = 4
    x = jax.random.normal(kx, (B, 1, 28, 28), dtype=jnp.float32)

    # Deterministic parameters (PyTorch weight convention: (out_features, in_features)).
    w1 = 0.05 * jax.random.normal(k1, (H1, D_IN), dtype=jnp.float32)
    w2 = 0.05 * jax.random.normal(k2, (H2, H1), dtype=jnp.float32)
    w3 = 0.05 * jax.random.normal(k3, (D_OUT, H2), dtype=jnp.float32)

    out = jax.block_until_ready(lenet_forward(x, w1, w2, w3))
    assert out.shape == (B, D_OUT)

    # Reference that mirrors the kernel's precision policy (bf16 matmul inputs,
    # f32 accumulation / elementwise).
    def ref_forward(xr, w1r, w2r, w3r):
        xbr = xr.reshape(-1, D_IN).astype(jnp.bfloat16)
        h1 = jnp.maximum(jnp.dot(xbr, w1r.astype(jnp.bfloat16).T,
                                 preferred_element_type=jnp.float32), 0.0)
        h2 = jnp.maximum(jnp.dot(h1.astype(jnp.bfloat16), w2r.astype(jnp.bfloat16).T,
                                 preferred_element_type=jnp.float32), 0.0)
        logits = jnp.dot(h2.astype(jnp.bfloat16), w3r.astype(jnp.bfloat16).T,
                         preferred_element_type=jnp.float32)
        return jax.nn.log_softmax(logits, axis=1)

    ref = ref_forward(x, w1, w2, w3)
    assert jnp.allclose(out, ref, atol=2e-3, rtol=2e-3), float(jnp.max(jnp.abs(out - ref)))

    # Looser sanity check against the pure-f32 PyTorch-style math.
    xb32 = x.reshape(-1, D_IN)
    ref32 = jax.nn.log_softmax(
        jnp.maximum(jnp.maximum(xb32 @ w1.T, 0.0) @ w2.T, 0.0) @ w3.T, axis=1)
    assert jnp.allclose(out, ref32, atol=5e-2, rtol=5e-2)

    # Exercise multi-step batch tiling (grid > 1) with a slightly larger batch.
    B2 = 512
    x2 = jax.random.normal(jax.random.PRNGKey(1), (B2, 1, 28, 28), dtype=jnp.float32)
    out2 = jax.block_until_ready(lenet_forward(x2, w1, w2, w3, tile_b=128))
    ref2 = ref_forward(x2, w1, w2, w3)
    assert out2.shape == (B2, D_OUT)
    assert jnp.allclose(out2, ref2, atol=2e-3, rtol=2e-3)

    print("KERNEL_OK")
</pallas_src>

<mosaic_0001>
module attributes {stable_mosaic.version = 11 : i64} {
  func.func @lenet_kernel(%arg0: i32, %arg1: memref<4x784xbf16, #tpu.memory_space<vmem>>, %arg2: memref<300x784xbf16, #tpu.memory_space<vmem>>, %arg3: memref<100x300xbf16, #tpu.memory_space<vmem>>, %arg4: memref<10x100xbf16, #tpu.memory_space<vmem>>, %arg5: memref<4x10xf32, #tpu.memory_space<vmem>>) attributes {dimension_semantics = [#tpu.dimension_semantics<parallel>], iteration_bounds = array<i64: 1>, scalar_prefetch = 0 : i64, scratch_operands = 0 : i64, tpu.core_type = #tpu.core_type<tc>, window_params = [{transform_indices = @transform_0, window_bounds = array<i64: 4, 784>}, {pipeline_mode = #tpu.pipeline_mode<synchronous>, transform_indices = @transform_1, window_bounds = array<i64: 300, 784>}, {pipeline_mode = #tpu.pipeline_mode<synchronous>, transform_indices = @transform_2, window_bounds = array<i64: 100, 300>}, {pipeline_mode = #tpu.pipeline_mode<synchronous>, transform_indices = @transform_3, window_bounds = array<i64: 10, 100>}, {transform_indices = @transform_4, window_bounds = array<i64: 4, 10>}]} {
    %c0 = arith.constant 0 : index
    %c0_0 = arith.constant 0 : index
    %0 = vector.load %arg1[%c0, %c0_0] : memref<4x784xbf16, #tpu.memory_space<vmem>>, vector<4x784xbf16>
    %c0_1 = arith.constant 0 : index
    %c0_2 = arith.constant 0 : index
    %1 = vector.load %arg2[%c0_1, %c0_2] : memref<300x784xbf16, #tpu.memory_space<vmem>>, vector<300x784xbf16>
    %cst = arith.constant dense<0.000000e+00> : vector<4x300xf32>
    %2 = tpu.matmul %0, %1, %cst {dimension_numbers = #tpu.dot_dimension_numbers<[1], [1], [0], [0], [0, 0, 1, 0], [], []>} : vector<4x784xbf16>, vector<300x784xbf16>, vector<4x300xf32> -> vector<4x300xf32>
    %cst_3 = arith.constant 0.000000e+00 : f32
    %3 = vector.broadcast %cst_3 : f32 to vector<4x300xf32>
    %4 = arith.maximumf %2, %3 : vector<4x300xf32>
    %5 = arith.truncf %4 : vector<4x300xf32> to vector<4x300xbf16>
    %c0_4 = arith.constant 0 : index
    %c0_5 = arith.constant 0 : index
    %6 = vector.load %arg3[%c0_4, %c0_5] : memref<100x300xbf16, #tpu.memory_space<vmem>>, vector<100x300xbf16>
    %cst_6 = arith.constant dense<0.000000e+00> : vector<4x100xf32>
    %7 = tpu.matmul %5, %6, %cst_6 {dimension_numbers = #tpu.dot_dimension_numbers<[1], [1], [0], [0], [0, 0, 1, 0], [], []>} : vector<4x300xbf16>, vector<100x300xbf16>, vector<4x100xf32> -> vector<4x100xf32>
    %cst_7 = arith.constant 0.000000e+00 : f32
    %8 = vector.broadcast %cst_7 : f32 to vector<4x100xf32>
    %9 = arith.maximumf %7, %8 : vector<4x100xf32>
    %10 = arith.truncf %9 : vector<4x100xf32> to vector<4x100xbf16>
    %c0_8 = arith.constant 0 : index
    %c0_9 = arith.constant 0 : index
    %11 = vector.load %arg4[%c0_8, %c0_9] : memref<10x100xbf16, #tpu.memory_space<vmem>>, vector<10x100xbf16>
    %cst_10 = arith.constant dense<0.000000e+00> : vector<4x10xf32>
    %12 = tpu.matmul %10, %11, %cst_10 {dimension_numbers = #tpu.dot_dimension_numbers<[1], [1], [0], [0], [0, 0, 1, 0], [], []>} : vector<4x100xbf16>, vector<10x100xbf16>, vector<4x10xf32> -> vector<4x10xf32>
    %cst_11 = arith.constant dense<0xFF800000> : vector<4xf32>
    %13 = vector.multi_reduction <maximumf>, %12, %cst_11 [1] : vector<4x10xf32> to vector<4xf32>
    %14 = vector.shape_cast %13 : vector<4xf32> to vector<4x1xf32>
    %15 = vector.broadcast %14 : vector<4x1xf32> to vector<4x10xf32>
    %16 = arith.subf %12, %15 : vector<4x10xf32>
    %17 = math.exp %16 : vector<4x10xf32>
    %cst_12 = arith.constant dense<0.000000e+00> : vector<4xf32>
    %18 = vector.multi_reduction <add>, %17, %cst_12 [1] : vector<4x10xf32> to vector<4xf32>
    %19 = vector.shape_cast %18 : vector<4xf32> to vector<4x1xf32>
    %20 = math.log %19 : vector<4x1xf32>
    %21 = vector.broadcast %20 : vector<4x1xf32> to vector<4x10xf32>
    %22 = arith.subf %16, %21 : vector<4x10xf32>
    %c0_13 = arith.constant 0 : index
    %c0_14 = arith.constant 0 : index
    %23 = vector.load %arg5[%c0_13, %c0_14] : memref<4x10xf32, #tpu.memory_space<vmem>>, vector<4x10xf32>
    tpu.vector_store %arg5[%c0_13, %c0_14], %22 {strides = array<i32>} : memref<4x10xf32, #tpu.memory_space<vmem>>, vector<4x10xf32>,
    return
  }
  func.func @transform_0(%arg0: i32) -> (i32, i32) {
    %c0_i32 = arith.constant 0 : i32
    %c0_i32_0 = arith.constant 0 : i32
    return %arg0, %c0_i32 : i32, i32
  }
  func.func @transform_1(%arg0: i32) -> (i32, i32) {
    %c0_i32 = arith.constant 0 : i32
    %c0_i32_0 = arith.constant 0 : i32
    %c0_i32_1 = arith.constant 0 : i32
    return %c0_i32, %c0_i32_0 : i32, i32
  }
  func.func @transform_2(%arg0: i32) -> (i32, i32) {
    %c0_i32 = arith.constant 0 : i32
    %c0_i32_0 = arith.constant 0 : i32
    %c0_i32_1 = arith.constant 0 : i32
    return %c0_i32, %c0_i32_0 : i32, i32
  }
  func.func @transform_3(%arg0: i32) -> (i32, i32) {
    %c0_i32 = arith.constant 0 : i32
    %c0_i32_0 = arith.constant 0 : i32
    %c0_i32_1 = arith.constant 0 : i32
    return %c0_i32, %c0_i32_0 : i32, i32
  }
  func.func @transform_4(%arg0: i32) -> (i32, i32) {
    %c0_i32 = arith.constant 0 : i32
    %c0_i32_0 = arith.constant 0 : i32
    return %arg0, %c0_i32 : i32, i32
  }
}

</mosaic_0001>

<bundles_post_ra>
// kernel: lenet_forward.1
= control target key start
LH: loop header
LB: loop body
LE: loop exit
PB: predicated region body
PF: predicated region fallthrough
CT: control target
= control target key end

     0   :  { %v2096_v10 = vmov 1983009808   ;;  %v179_v12 = vlaneseq  ;;  %s2703_s0 = inlined_call_operand.vmem [shape: bf16[4,784], index: 0, kind: input, shape index: {}]   ;;  %s2704_s1 = inlined_call_operand.vmem [shape: bf16[300,784], index: 1, kind: input, shape index: {}]   ;;  %s2705_s2 = inlined_call_operand.vmem [shape: bf16[100,300], index: 2, kind: input, shape index: {}]   ;;  %s2706_s3 = inlined_call_operand.vmem [shape: bf16[10,100], index: 3, kind: input, shape index: {}]   ;;  %s2707_s4 = inlined_call_operand.hbm [shape: f32[4,10], index: 4, kind: output, shape index: {}]  }
   0x1   :  { %v1848_v0 = vld [vmem:[%s2704_s1 + $0xc] ss:$28 sps:$4 sm:$0xff]   ;;  %v1851_v2 = vld [vmem:[%s2704_s1 + $0x44] ss:$28 sps:$4 sm:$0xff]   ;;  %v1854_v4 = vld [vmem:[%s2704_s1 + $0x7c] ss:$28 sps:$4 sm:$0xff]   ;;  %v177_v11 = vunpack.c.l.s4 %v2096_v10 }
   0x2   :  { %v1850_v1 = vld [vmem:[%s2704_s1 + $0x8] ss:$28 sps:$4 sm:$0xff]   ;;  %981 = vmatprep.subr.bf16.mxu0 %v1848_v0  ;;  %v1853_v3 = vld [vmem:[%s2704_s1 + $0x40] ss:$28 sps:$4 sm:$0xff]   ;;  %v1856_v5 = vld [vmem:[%s2704_s1 + $0x78] ss:$28 sps:$4 sm:$0xff]  }
   0x3   :  { %982 = vmatpush1.bf16.xpose.msra.mxu0 %v1850_v1  ;;  %v1880_v6 = vld [vmem:[%s2704_s1 + $0x4] ss:$28 sps:$4 sm:$0xff]   ;;  %v1857_v8 = vld [vmem:[%s2704_s1 + $0xb4] ss:$28 sps:$4 sm:$0xff]   ;;  %v1886_v9 = vld [vmem:[%s2704_s1 + $0x3c] ss:$28 sps:$4 sm:$0xff]   ;;  %v178_v17 = vunpack.c.0.s8 %v177_v11 }
   0x4   :  { %983 = vmatprep.subr.bf16.mxu0 %v1851_v2  ;;  %v1883_v7 = vld [vmem:[%s2704_s1] ss:$28 sps:$4 sm:$0xff]   ;;  %940 = vmatprep.subr.bf16.mxu1 %v1880_v6  ;;  %v1889_v13 = vld [vmem:[%s2704_s1 + $0x38] ss:$28 sps:$4 sm:$0xff]   ;;  %v1859_v14 = vld [vmem:[%s2704_s1 + $0xb0] ss:$28 sps:$4 sm:$0xff]  }
   0x5   :  { %941 = vmatpush1.bf16.xpose.msra.mxu1 %v1883_v7  ;;  %v1892_v15 = vld [vmem:[%s2704_s1 + $0x74] ss:$28 sps:$4 sm:$0xff]   ;;  %v1860_v16 = vld [vmem:[%s2704_s1 + $0xec] ss:$28 sps:$4 sm:$0xff]   ;;  %v180_v18 = vshrl.u32 %v179_v12, 7  ;;  %v19_v20 = vld [vmem:[%s2703_s0] sm:$0xff] }
   0x6   :  { %942 = vmatprep.subr.bf16.mxu1 %v1886_v9  ;;  %v1862_v21 = vld [vmem:[%s2704_s1 + $0xe8] ss:$28 sps:$4 sm:$0xff]   ;;  %v1895_v22 = vld [vmem:[%s2704_s1 + $0x70] ss:$28 sps:$4 sm:$0xff]   ;;  %v175_v23 = vcombine.high %v19_v20, %v19_v20  ;;  %v1865_v28 = vld [vmem:[%s2704_s1 + $0x120] ss:$28 sps:$4 sm:$0xff]  }
   0x7   :  { %v2167_v19 = vsub.s32 %v178_v17, %v180_v18  ;;  %v1898_v24 = vld [vmem:[%s2704_s1 + $0xac] ss:$28 sps:$4 sm:$0xff]   ;;  %v1863_v25 = vld [vmem:[%s2704_s1 + $0x124] ss:$28 sps:$4 sm:$0xff]   ;;  %v1866_v31 = vld [vmem:[%s2704_s1 + $0x15c] ss:$28 sps:$4 sm:$0xff]  }
   0x8   :  { %v1901_v29 = vld [vmem:[%s2704_s1 + $0xa8] ss:$28 sps:$4 sm:$0xff]   ;;  %v1868_v32 = vld [vmem:[%s2704_s1 + $0x158] ss:$28 sps:$4 sm:$0xff]   ;;  %v1907_v34 = vld [vmem:[%s2704_s1 + $0xe0] ss:$28 sps:$4 sm:$0xff]  }
   0x9   :  { %v2185_v26 = vrot.slane %v175_v23, %v2167_v19  ;;  %v1904_v30 = vld [vmem:[%s2704_s1 + $0xe4] ss:$28 sps:$4 sm:$0xff]   ;;  %v1869_v33 = vld [vmem:[%s2704_s1 + $0x194] ss:$28 sps:$4 sm:$0xff]   ;;  %v1910_v35 = vld [vmem:[%s2704_s1 + $0x11c] ss:$28 sps:$4 sm:$0xff]   ;;  %v2256_v49 = vrot.slane %v19_v20, %v2167_v19 }
   0xa   :  { %v1913_v36 = vld [vmem:[%s2704_s1 + $0x118] ss:$28 sps:$4 sm:$0xff]   ;;  %v1871_v37 = vld [vmem:[%s2704_s1 + $0x190] ss:$28 sps:$4 sm:$0xff]   ;;  %v1874_v41 = vld [vmem:[%s2704_s1 + $0x1c8] ss:$28 sps:$4 sm:$0xff]  }
   0xb   :  { %984 = vmatpush1.bf16.xpose.msra.mxu0 %v1853_v3  ;;  %v2189_v27 = vcombine.high %v2185_v26, %v2185_v26  ;;  %v1918_v38 = vld [vmem:[%s2704_s1 + $0x154] ss:$28 sps:$4 sm:$0xff]   ;;  %v1872_v39 = vld [vmem:[%s2704_s1 + $0x1cc] ss:$28 sps:$4 sm:$0xff]   ;;  %v1875_v43 = vld [vmem:[%s2704_s1 + $0x204] ss:$28 sps:$4 sm:$0xff]   ;;  %v2269_v53 = vcombine.high %v2256_v49, %v2256_v49 }
   0xc   :  { %985 = vmatprep.subr.bf16.mxu0 %v1854_v4  ;;  %v1920_v40 = vld [vmem:[%s2704_s1 + $0x150] ss:$28 sps:$4 sm:$0xff]   ;;  %v1926_v44 = vld [vmem:[%s2704_s1 + $0x188] ss:$28 sps:$4 sm:$0xff]   ;;  %v1877_v45 = vld [vmem:[%s2704_s1 + $0x200] ss:$28 sps:$4 sm:$0xff]  }
   0xd   :  { %943 = vmatpush1.bf16.xpose.msra.mxu1 %v1889_v13  ;;  %1013 = vmatprep.mubr.bf16.mxu0 %v2189_v27  ;;  %v1924_v42 = vld [vmem:[%s2704_s1 + $0x18c] ss:$28 sps:$4 sm:$0xff]   ;;  %v1930_v46 = vld [vmem:[%s2704_s1 + $0x1c4] ss:$28 sps:$4 sm:$0xff]   ;;  %v1878_v47 = vld [vmem:[%s2704_s1 + $0x23c] ss:$28 sps:$4 sm:$0xff]  }
   0xe   :  { %944 = vmatprep.subr.bf16.mxu1 %v1892_v15  ;;  %v1932_v48 = vld [vmem:[%s2704_s1 + $0x1c0] ss:$28 sps:$4 sm:$0xff]   ;;  %v1882_v50 = vld [vmem:[%s2704_s1 + $0x238] ss:$28 sps:$4 sm:$0xff]   ;;  %972 = vmatprep.mubr.bf16.mxu1 %v2269_v53  ;;  %v1888_v55 = vld [vmem:[%s2704_s1 + $0x270] ss:$28 sps:$4 sm:$0xff]  }
   0xf   :  { %v1936_v51 = vld [vmem:[%s2704_s1 + $0x1fc] ss:$28 sps:$4 sm:$0xff]   ;;  %v1884_v52 = vld [vmem:[%s2704_s1 + $0x274] ss:$28 sps:$4 sm:$0xff]   ;;  %v1890_v57 = vld [vmem:[%s2704_s1 + $0x2ac] ss:$28 sps:$4 sm:$0xff]  }
  0x10   :  { %v1938_v54 = vld [vmem:[%s2704_s1 + $0x1f8] ss:$28 sps:$4 sm:$0xff]  }
  0x11   :  { %v1942_v56 = vld [vmem:[%s2704_s1 + $0x234] ss:$28 sps:$4 sm:$0xff]  }
  0x13   :  { %986 = vmatpush1.bf16.xpose.msra.mxu0 %v1856_v5 }
  0x14   :  { %987 = vmatprep.subr.bf16.mxu0 %v1857_v8 }
  0x15   :  { %945 = vmatpush1.bf16.xpose.msra.mxu1 %v1895_v22 }
  0x16   :  { %946 = vmatprep.subr.bf16.mxu1 %v1898_v24 }
  0x1b   :  { %988 = vmatpush1.bf16.xpose.msra.mxu0 %v1859_v14 }
  0x1c   :  { %989 = vmatprep.subr.bf16.mxu0 %v1860_v16 }
  0x1d   :  { %947 = vmatpush1.bf16.xpose.msra.mxu1 %v1901_v29 }
  0x1e   :  { %948 = vmatprep.subr.bf16.mxu1 %v1904_v30 }
  0x23   :  { %990 = vmatpush1.bf16.xpose.msra.mxu0 %v1862_v21 }
  0x24   :  { %991 = vmatprep.subr.bf16.mxu0 %v1863_v25 }
  0x25   :  { %949 = vmatpush1.bf16.xpose.msra.mxu1 %v1907_v34 }
  0x26   :  { %950 = vmatprep.subr.bf16.mxu1 %v1910_v35 }
  0x2b   :  { %992 = vmatpush1.bf16.xpose.msra.mxu0 %v1865_v28 }
  0x2c   :  { %993 = vmatprep.subr.bf16.mxu0 %v1866_v31 }
  0x2d   :  { %951 = vmatpush1.bf16.xpose.msra.mxu1 %v1913_v36 }
  0x2e   :  { %952 = vmatprep.subr.bf16.mxu1 %v1918_v38 }
  0x33   :  { %994 = vmatpush1.bf16.xpose.msra.mxu0 %v1868_v32 }
  0x34   :  { %995 = vmatprep.subr.bf16.mxu0 %v1869_v33 }
  0x35   :  { %953 = vmatpush1.bf16.xpose.msra.mxu1 %v1920_v40 }
  0x36   :  { %954 = vmatprep.subr.bf16.mxu1 %v1924_v42 }
  0x3b   :  { %996 = vmatpush1.bf16.xpose.msra.mxu0 %v1871_v37 }
  0x3c   :  { %997 = vmatprep.subr.bf16.mxu0 %v1872_v39 }
  0x3d   :  { %955 = vmatpush1.bf16.xpose.msra.mxu1 %v1926_v44 }
  0x3e   :  { %956 = vmatprep.subr.bf16.mxu1 %v1930_v46 }
  0x43   :  { %998 = vmatpush1.bf16.xpose.msra.mxu0 %v1874_v41 }
  0x44   :  { %999 = vmatprep.subr.bf16.mxu0 %v1875_v43 }
  0x45   :  { %957 = vmatpush1.bf16.xpose.msra.mxu1 %v1932_v48 }
  0x46   :  { %958 = vmatprep.subr.bf16.mxu1 %v1936_v51 }
  0x4b   :  { %1000 = vmatpush1.bf16.xpose.msra.mxu0 %v1877_v45 }
  0x4c   :  { %1001 = vmatprep.subr.bf16.mxu0 %v1878_v47 }
  0x4d   :  { %959 = vmatpush1.bf16.xpose.msra.mxu1 %v1938_v54 }
  0x53   :  { %1002 = vmatpush1.bf16.xpose.msra.mxu0 %v1882_v50 }
  0x54   :  { %1003 = vmatprep.subr.bf16.mxu0 %v1884_v52 }
  0x55   :  { %9 = vsyncpa [#allocation3], 0  ;;  %960 = vmatprep.subr.bf16.mxu1 %v1942_v56  ;;  %v1944_v58 = vld [vmem:[%s2704_s1 + $0x230] ss:$28 sps:$4 sm:$0xff]   ;;  %v1894_v59 = vld [vmem:[%s2704_s1 + $0x2a8] ss:$28 sps:$4 sm:$0xff]  }
  0x56   :  { %v1948_v60 = vld [vmem:[%s2704_s1 + $0x26c] ss:$28 sps:$4 sm:$0xff]   ;;  %v1896_v61 = vld [vmem:[%s2704_s1 + $0x2e4] ss:$28 sps:$4 sm:$0xff]   ;;  %961 = vmatpush1.bf16.xpose.msra.mxu1 %v1944_v58  ;;  %v1902_v1 = vld [vmem:[%s2704_s1 + $0x31c] ss:$28 sps:$4 sm:$0xff]  }
  0x57   :  { %962 = vmatprep.subr.bf16.mxu1 %v1948_v60  ;;  %v1950_v62 = vld [vmem:[%s2704_s1 + $0x268] ss:$28 sps:$4 sm:$0xff]   ;;  %v1900_v63 = vld [vmem:[%s2704_s1 + $0x2e0] ss:$28 sps:$4 sm:$0xff]   ;;  %v1906_v3 = vld [vmem:[%s2704_s1 + $0x318] ss:$28 sps:$4 sm:$0xff]  }
  0x58   :  { %v1954_v0 = vld [vmem:[%s2704_s1 + $0x2a4] ss:$28 sps:$4 sm:$0xff]   ;;  %v1960_v4 = vld [vmem:[%s2704_s1 + $0x2dc] ss:$28 sps:$4 sm:$0xff]   ;;  %v1908_v5 = vld [vmem:[%s2704_s1 + $0x354] ss:$28 sps:$4 sm:$0xff]  }
  0x59   :  { %v1956_v2 = vld [vmem:[%s2704_s1 + $0x2a0] ss:$28 sps:$4 sm:$0xff]   ;;  %v1962_v6 = vld [vmem:[%s2704_s1 + $0x2d8] ss:$28 sps:$4 sm:$0xff]   ;;  %v1912_v7 = vld [vmem:[%s2704_s1 + $0x350] ss:$28 sps:$4 sm:$0xff]  }
  0x5a   :  { %v1966_v8 = vld [vmem:[%s2704_s1 + $0x314] ss:$28 sps:$4 sm:$0xff]   ;;  %v2335_v10 = vld [vmem:[%s2703_s0 + $0x8] sm:$0x3f]  ;;  %v1980_v20 = vld [vmem:[%s2704_s1 + $0x384] ss:$28 sps:$4 sm:$0xff]  }
  0x5b   :  { %1004 = vmatpush1.bf16.xpose.msra.mxu0 %v1888_v55  ;;  %v1917_v9 = vld [vmem:[%s2704_s1 + $0x14] ss:$28 sps:$4 sm:$0xff]   ;;  %v2339_v11 = vrot.slane %v2335_v10, %v2167_v19  ;;  %v1972_v14 = vld [vmem:[%s2704_s1 + $0x34c] ss:$28 sps:$4 sm:$0xff]   ;;  %v1929_v21 = vld [vmem:[%s2704_s1 + $0x84] ss:$28 sps:$4 sm:$0xff]  }
  0x5c   :  { %1005 = vmatprep.subr.bf16.mxu0 %v1890_v57  ;;  %v1968_v12 = vld [vmem:[%s2704_s1 + $0x310] ss:$28 sps:$4 sm:$0xff]   ;;  %v1974_v17 = vld [vmem:[%s2704_s1 + $0x348] ss:$28 sps:$4 sm:$0xff]   ;;  %v1978_v22 = vld [vmem:[%s2704_s1 + $0x380] ss:$28 sps:$4 sm:$0xff]  }
  0x5d   :  { %v1915_v13 = vld [vmem:[%s2704_s1 + $0x10] ss:$28 sps:$4 sm:$0xff]   ;;  %v2355_v16 = vcombine.high %v2339_v11, %v2339_v11  ;;  %v1921_v18 = vld [vmem:[%s2704_s1 + $0x48] ss:$28 sps:$4 sm:$0xff]   ;;  %v1927_v23 = vld [vmem:[%s2704_s1 + $0x80] ss:$28 sps:$4 sm:$0xff]  }
  0x5e   :  { %963 = vmatpush1.bf16.xpose.msra.mxu1 %v1950_v62  ;;  %v1923_v15 = vld [vmem:[%s2704_s1 + $0x4c] ss:$28 sps:$4 sm:$0xff]   ;;  %v1986_v24 = vld [vmem:[%s2704_s1 + $0x3bc] ss:$28 sps:$4 sm:$0xff]   ;;  %v1941_v31 = vld [vmem:[%s2704_s1 + $0xf4] ss:$28 sps:$4 sm:$0xff]  }
  0x5f   :  { %964 = vmatprep.subr.bf16.mxu1 %v1954_v0  ;;  %v1935_v25 = vld [vmem:[%s2704_s1 + $0xbc] ss:$28 sps:$4 sm:$0xff]   ;;  %v1992_v30 = vld [vmem:[%s2704_s1 + $0x3f4] ss:$28 sps:$4 sm:$0x3f]   ;;  %v2097_v57 = vmov 0.0  }
  0x60   :  { %v1984_v28 = vld [vmem:[%s2704_s1 + $0x3b8] ss:$28 sps:$4 sm:$0xff]   ;;  %v1990_v32 = vld [vmem:[%s2704_s1 + $0x3f0] ss:$28 sps:$4 sm:$0x3f]   ;;  %vm879_vm0 = vcmask 130048  }
  0x61   :  { %v1933_v29 = vld [vmem:[%s2704_s1 + $0xb8] ss:$28 sps:$4 sm:$0xff]   ;;  %v1939_v33 = vld [vmem:[%s2704_s1 + $0xf0] ss:$28 sps:$4 sm:$0xff]   ;;  %v1996_v36 = vld [vmem:[%s2704_s1 + $0x388] ss:$28 sps:$4 sm:$0xff]  }
  0x62   :  { %v1998_v34 = vld [vmem:[%s2704_s1 + $0x38c] ss:$28 sps:$4 sm:$0xff]   ;;  %v2004_v38 = vld [vmem:[%s2704_s1 + $0x3c4] ss:$28 sps:$4 sm:$0xff]   ;;  %v1959_v43 = vld [vmem:[%s2704_s1 + $0x19c] ss:$28 sps:$4 sm:$0xff]  }
  0x63   :  { %1006 = vmatpush1.bf16.xpose.msra.mxu0 %v1894_v59  ;;  %v1947_v35 = vld [vmem:[%s2704_s1 + $0x12c] ss:$28 sps:$4 sm:$0xff]   ;;  %v1953_v39 = vld [vmem:[%s2704_s1 + $0x164] ss:$28 sps:$4 sm:$0xff]   ;;  %v1957_v44 = vld [vmem:[%s2704_s1 + $0x198] ss:$28 sps:$4 sm:$0xff]  }
  0x64   :  { %1007 = vmatprep.subr.bf16.mxu0 %v1896_v61  ;;  %v1945_v37 = vld [vmem:[%s2704_s1 + $0x128] ss:$28 sps:$4 sm:$0xff]   ;;  %v2002_v40 = vld [vmem:[%s2704_s1 + $0x3c0] ss:$28 sps:$4 sm:$0xff]   ;;  %v2016_v45 = vld [vmem:[%s2704_s1 + $0x394] ss:$28 sps:$4 sm:$0xff]  }
  0x65   :  { %v1951_v41 = vld [vmem:[%s2704_s1 + $0x160] ss:$28 sps:$4 sm:$0xff]   ;;  %v1965_v46 = vld [vmem:[%s2704_s1 + $0x1d4] ss:$28 sps:$4 sm:$0xff]   ;;  %v1971_v50 = vld [vmem:[%s2704_s1 + $0x20c] ss:$28 sps:$4 sm:$0xff]  }
  0x66   :  { %965 = vmatpush1.bf16.xpose.msra.mxu1 %v1956_v2  ;;  %v2010_v42 = vld [vmem:[%s2704_s1 + $0x3fc] ss:$28 sps:$4 sm:$0x3f]   ;;  %v2014_v47 = vld [vmem:[%s2704_s1 + $0x390] ss:$28 sps:$4 sm:$0xff]   ;;  %vm2098_vm1 = vmmov 0  }
  0x67   :  { %966 = vmatprep.subr.bf16.mxu1 %v1960_v4  ;;  %v1963_v48 = vld [vmem:[%s2704_s1 + $0x1d0] ss:$28 sps:$4 sm:$0xff]   ;;  %v2019_v51 = vld [vmem:[%s2704_s1 + $0x3c8] ss:$28 sps:$4 sm:$0xff]   ;;  %v1975_v55 = vld [vmem:[%s2704_s1 + $0x240] ss:$28 sps:$4 sm:$0xff]  }
  0x68   :  { %v1969_v52 = vld [vmem:[%s2704_s1 + $0x208] ss:$28 sps:$4 sm:$0xff]   ;;  %v2024_v54 = vld [vmem:[%s2704_s1 + $0x400] ss:$28 sps:$4 sm:$0x3f]   ;;  %vm1510_vm2 = vcmask 818176  }
  0x69   :  { %v1983_v56 = vld [vmem:[%s2704_s1 + $0x27c] ss:$28 sps:$4 sm:$0xff]   ;;  %v1989_v61 = vld [vmem:[%s2704_s1 + $0x2b4] ss:$28 sps:$4 sm:$0xff]   ;;  %vm1396_vm3 = vcmask 359424   ;;  %vm1557_vm4 = vcmask 76800  }
  0x6a   :  { %v2029_v58 = vld [vmem:[%s2704_s1 + $0x398] ss:$28 sps:$4 sm:$0xff]   ;;  %v2032_v62 = vld [vmem:[%s2704_s1 + $0x3d0] ss:$28 sps:$4 sm:$0xff]  }
  0x6b   :  { %1008 = vmatpush1.bf16.xpose.msra.mxu0 %v1900_v63  ;;  %v1981_v59 = vld [vmem:[%s2704_s1 + $0x278] ss:$28 sps:$4 sm:$0xff]   ;;  %v932_v60 = vsel %vm879_vm0, %v2029_v58, 0  ;;  %v1987_v63 = vld [vmem:[%s2704_s1 + $0x2b0] ss:$28 sps:$4 sm:$0xff]   ;;  %v935_v0 = vsel %vm879_vm0, %v2032_v62, 0 }
  0x6c   :  { %1009 = vmatprep.subr.bf16.mxu0 %v1902_v1  ;;  %v1995_v1 = vld [vmem:[%s2704_s1 + $0x2ec] ss:$28 sps:$4 sm:$0xff]  }
  0x6d   :  { %v2035_v2 = vld [vmem:[%s2704_s1 + $0x408] ss:$28 sps:$4 sm:$0x3f]  }
  0x6e   :  { %967 = vmatpush1.bf16.xpose.msra.mxu1 %v1962_v6  ;;  %v938_v4 = vsel %vm879_vm0, %v2035_v2, 0  ;;  %v2001_v6 = vld [vmem:[%s2704_s1 + $0x324] ss:$28 sps:$4 sm:$0xff]  }
  0x6f   :  { %968 = vmatprep.subr.bf16.mxu1 %v1966_v8 }
  0x73   :  { %1010 = vmatpush1.bf16.xpose.msra.mxu0 %v1906_v3  ;;  %v1993_v3 = vld [vmem:[%s2704_s1 + $0x2e8] ss:$28 sps:$4 sm:$0xff]  }
  0x74   :  { %1011 = vmatprep.subr.bf16.mxu0 %v1908_v5  ;;  %v2042_v5 = vld [vmem:[%s2705_s2 + $0x4] ss:$12 sps:$4 sm:$0xff]  }
  0x76   :  { %969 = vmatpush1.bf16.xpose.msra.mxu1 %v1968_v12  ;;  %v1999_v12 = vld [vmem:[%s2704_s1 + $0x320] ss:$28 sps:$4 sm:$0xff]  }
  0x77   :  { %970 = vmatprep.subr.bf16.mxu1 %v1972_v14  ;;  %v2005_v14 = vld [vmem:[%s2704_s1 + $0x358] ss:$28 sps:$4 sm:$0xff]  }
  0x7b   :  { %1012 = vmatpush1.bf16.xpose.msra.mxu0 %v1912_v7  ;;  %v192_v7 = vcombine.high %v2335_v10, %v2335_v10  ;;  %v2007_v10 = vld [vmem:[%s2704_s1 + $0x35c] ss:$28 sps:$4 sm:$0xff]  }
  0x7c   :  { %1022 = vmatprep.subr.bf16.mxu0 %v1917_v9  ;;  %v2040_v9 = vld [vmem:[%s2705_s2] ss:$12 sps:$4 sm:$0xff]  }
  0x7d   :  { %v2524_v8 = vrot.slane %v192_v7, %v2167_v19  ;;  %v2043_v19 = vld [vmem:[%s2705_s2 + $0x18] ss:$12 sps:$4 sm:$0xff]  }
  0x7e   :  { %971 = vmatpush1.bf16.xpose.msra.mxu1 %v1974_v17  ;;  %v2013_v17 = vld [vmem:[%s2704_s1 + $0x18] ss:$28 sps:$4 sm:$0xff]  }
  0x7f   :  { %1104 = vmatprep.subr.bf16.mxu1 %v1980_v20  ;;  %v884_v20 = vsel %vm879_vm0, %v2013_v17, 0  ;;  %v2065_v17 = vld [vmem:[%s2705_s2 + $0x80] ss:$12 sps:$4 sm:$0xff]  }
  0x82   :  { %1014 = vmatmul.mubr.bf16.vlgmr.msra.gmra.mrb[0].mxu0 %v2185_v26 }
  0x83   :  { %1023 = vmatpush1.bf16.xpose.msra.mxu0 %v1915_v13  ;;  %1054 = vmatprep.mubr.bf16.mxu0 %v2355_v16  ;;  %v2045_v13 = vld [vmem:[%s2705_s2 + $0x1c] ss:$12 sps:$4 sm:$0xff]  }
  0x84   :  { %1024 = vmatprep.subr.bf16.mxu0 %v1923_v15  ;;  %v2048_v15 = vld [vmem:[%s2705_s2 + $0x34] ss:$12 sps:$4 sm:$0xff]  }
  0x85   :  { %973 = vmatmul.mubr.bf16.vlgmr.msra.gmra.mrb[0].mxu1 %v2256_v49 }
  0x86   :  { %1105 = vmatpush1.bf16.xpose.msra.mxu1 %v1978_v22  ;;  %1136 = vmatprep.mubr.bf16.mxu1 %v2269_v53  ;;  %v2026_v53 = vld [vmem:[%s2704_s1 + $0x404] ss:$28 sps:$4 sm:$0x3f]   ;;  %v2051_v22 = vld [vmem:[%s2705_s2 + $0x4c] ss:$12 sps:$4 sm:$0xff]  }
  0x87   :  { %1106 = vmatprep.subr.bf16.mxu1 %v1986_v24  ;;  %v2049_v24 = vld [vmem:[%s2705_s2 + $0x48] ss:$12 sps:$4 sm:$0xff]  }
  0x8b   :  { %1025 = vmatpush1.bf16.xpose.msra.mxu0 %v1921_v18  ;;  %v2046_v18 = vld [vmem:[%s2705_s2 + $0x30] ss:$12 sps:$4 sm:$0xff]  }
  0x8c   :  { %1026 = vmatprep.subr.bf16.mxu0 %v1929_v21  ;;  %v2017_v21 = vld [vmem:[%s2704_s1 + $0x210] ss:$28 sps:$4 sm:$0xff]  }
  0x8e   :  { %1107 = vmatpush1.bf16.xpose.msra.mxu1 %v1984_v28  ;;  %v2022_v28 = vld [vmem:[%s2704_s1 + $0x248] ss:$28 sps:$4 sm:$0xff]  }
  0x8f   :  { %1108 = vmatprep.subr.bf16.mxu1 %v1992_v30  ;;  %v2052_v30 = vld [vmem:[%s2705_s2 + $0x60] ss:$12 sps:$4 sm:$0xff]  }
  0x93   :  { %1027 = vmatpush1.bf16.xpose.msra.mxu0 %v1927_v23  ;;  %v2018_v23 = vld [vmem:[%s2704_s1 + $0x50] ss:$28 sps:$4 sm:$0xff]  }
  0x94   :  { %1028 = vmatprep.subr.bf16.mxu0 %v1935_v25  ;;  %v887_v25 = vsel %vm879_vm0, %v2018_v23, 0 }
  0x96   :  { %1109 = vmatpush1.bf16.xpose.msra.mxu1 %v1990_v32  ;;  %v2027_v32 = vld [vmem:[%s2704_s1 + $0x280] ss:$28 sps:$4 sm:$0xff]  }
  0x97   :  { %1144 = vmatprep.subr.bf16.mxu1 %v1998_v34 }
  0x9b   :  { %1029 = vmatpush1.bf16.xpose.msra.mxu0 %v1933_v29  ;;  %v2023_v29 = vld [vmem:[%s2704_s1 + $0x88] ss:$28 sps:$4 sm:$0xff]  }
  0x9c   :  { %1030 = vmatprep.subr.bf16.mxu0 %v1941_v31  ;;  %v890_v31 = vsel %vm879_vm0, %v2023_v29, 0 }
  0x9d   :  { %1137 = vmatmul.mubr.bf16.vlgmr.msra.gmra.mrb[4].mxu1 %v2256_v49  ;;  %v2021_v49 = vld [vmem:[%s2704_s1 + $0x3cc] ss:$28 sps:$4 sm:$0xff]  }
  0x9e   :  { %1145 = vmatpush1.bf16.xpose.msra.mxu1 %v1996_v36  ;;  %1176 = vmatprep.mubr.bf16.mxu1 %v2189_v27  ;;  %v2008_v27 = vld [vmem:[%s2704_s1 + $0x3f8] ss:$28 sps:$4 sm:$0x3f]  }
  0x9f   :  { %1146 = vmatprep.subr.bf16.mxu1 %v2004_v38  ;;  %v2031_v36 = vld [vmem:[%s2704_s1 + $0xf8] ss:$28 sps:$4 sm:$0xff]   ;;  %v2033_v38 = vld [vmem:[%s2704_s1 + $0x2f0] ss:$28 sps:$4 sm:$0xff]  }
  0xa3   :  { %1031 = vmatpush1.bf16.xpose.msra.mxu0 %v1939_v33  ;;  %v2028_v33 = vld [vmem:[%s2704_s1 + $0xc0] ss:$28 sps:$4 sm:$0xff]  }
  0xa4   :  { %1032 = vmatprep.subr.bf16.mxu0 %v1947_v35  ;;  %v893_v34 = vsel %vm879_vm0, %v2028_v33, 0  ;;  %v2030_v35 = vld [vmem:[%s2704_s1 + $0x2b8] ss:$28 sps:$4 sm:$0xff]  }
  0xa6   :  { %1147 = vmatpush1.bf16.xpose.msra.mxu1 %v2002_v40 }
  0xa7   :  { %1148 = vmatprep.subr.bf16.mxu1 %v2010_v42  ;;  %v2037_v42 = vld [vmem:[%s2704_s1 + $0x168] ss:$28 sps:$4 sm:$0xff]  }
  0xab   :  { %1033 = vmatpush1.bf16.xpose.msra.mxu0 %v1945_v37  ;;  %v896_v37 = vsel %vm879_vm0, %v2031_v36, 0 }
  0xac   :  { %1034 = vmatprep.subr.bf16.mxu0 %v1953_v39  ;;  %v2034_v39 = vld [vmem:[%s2704_s1 + $0x130] ss:$28 sps:$4 sm:$0xff]  }
  0xad   :  { %v899_v40 = vsel %vm879_vm0, %v2034_v39, 0 }
  0xae   :  { %1149 = vmatpush1.bf16.xpose.msra.mxu1 %v2008_v27  ;;  %v2038_v27 = vld [vmem:[%s2704_s1 + $0x360] ss:$28 sps:$4 sm:$0xff]  }
  0xaf   :  { %1184 = vmatprep.subr.bf16.mxu1 %v2016_v45 }
  0xb3   :  { %1035 = vmatpush1.bf16.xpose.msra.mxu0 %v1951_v41  ;;  %v2036_v41 = vld [vmem:[%s2704_s1 + $0x328] ss:$28 sps:$4 sm:$0xff]  }
  0xb4   :  { %1036 = vmatprep.subr.bf16.mxu0 %v1959_v43  ;;  %v902_v43 = vsel %vm879_vm0, %v2037_v42, 0 }
  0xb5   :  { %1177 = vmatmul.mubr.bf16.vlgmr.msra.gmra.mrb[4].mxu1 %v2185_v26  ;;  %v1977_v26 = vld [vmem:[%s2704_s1 + $0x244] ss:$28 sps:$4 sm:$0xff]  }
  0xb6   :  { %1185 = vmatpush1.bf16.xpose.msra.mxu1 %v2014_v47  ;;  %1216 = vmatprep.mubr.bf16.mxu1 %v2355_v16  ;;  %v2012_v16 = vld [vmem:[%s2704_s1 + $0x1d8] ss:$28 sps:$4 sm:$0xff]   ;;  %v2057_v47 = vld [vmem:[%s2705_s2 + $0x7c] ss:$12 sps:$4 sm:$0xff]  }
  0xb7   :  { %1186 = vmatprep.subr.bf16.mxu1 %v2021_v49 }
  0xbb   :  { %1037 = vmatpush1.bf16.xpose.msra.mxu0 %v1957_v44  ;;  %v2039_v44 = vld [vmem:[%s2704_s1 + $0x1a0] ss:$28 sps:$4 sm:$0xff]  }
  0xbc   :  { %1038 = vmatprep.subr.bf16.mxu0 %v1965_v46  ;;  %v905_v45 = vsel %vm879_vm0, %v2039_v44, 0  ;;  %v2055_v46 = vld [vmem:[%s2705_s2 + $0x78] ss:$12 sps:$4 sm:$0xff]  }
  0xbe   :  { %1187 = vmatpush1.bf16.xpose.msra.mxu1 %v2019_v51 }
  0xbf   :  { %1188 = vmatprep.subr.bf16.mxu1 %v2026_v53 }
  0xc3   :  { %1039 = vmatpush1.bf16.xpose.msra.mxu0 %v1963_v48 }
  0xc4   :  { %1040 = vmatprep.subr.bf16.mxu0 %v1971_v50 }
  0xc6   :  { %1189 = vmatpush1.bf16.xpose.msra.mxu1 %v2024_v54 }
  0xc7   :  { %1776 = vmatprep.subr.bf16.mxu1 %v2097_v57 }
  0xcb   :  { %1041 = vmatpush1.bf16.xpose.msra.mxu0 %v1969_v52  ;;  %v1294_v52 = vld [vmem:[%s2705_s2 + $0x90] sm:$0x33] }
  0xcc   :  { %1042 = vmatprep.subr.bf16.mxu0 %v1977_v26  ;;  %v1739_v53 = vcombine.high %v1294_v52, %v1294_v52  ;;  %v1738_v26 = vcombine.low %v1294_v52, %v1294_v52 }
  0xcd   :  { %1217 = vmatmul.mubr.bf16.vlgmr.msra.gmra.mrb[4].mxu1 %v2339_v11 }
  0xce   :  { %1777 = vmatpush3.bf16.xpose.msra.mxu1 %v932_v60  ;;  %1782 = vmatprep.mubr.msk.bf16.mxu1 %vm2098_vm1, %v2097_v57 }
  0xcf   :  { %1778 = vmatprep.subr.bf16.mxu1 %v2097_v57 }
  0xd3   :  { %1043 = vmatpush1.bf16.xpose.msra.mxu0 %v1975_v55 }
  0xd4   :  { %1044 = vmatprep.subr.bf16.mxu0 %v1983_v56 }
  0xd6   :  { %1779 = vmatpush3.bf16.xpose.msra.mxu1 %v935_v0 }
  0xd7   :  { %1780 = vmatprep.subr.bf16.mxu1 %v2097_v57 }
  0xdb   :  { %1045 = vmatpush1.bf16.xpose.msra.mxu0 %v1981_v59  ;;  %v2067_v59 = vld [vmem:[%s2706_s3] sm:$0x1f]  }
  0xdc   :  { %1046 = vmatprep.subr.bf16.mxu0 %v1989_v61  ;;  %v1515_v60 = vsel %vm1510_vm2, %v2067_v59, 0 }
  0xde   :  { %1781 = vmatpush3.bf16.xpose.msra.mxu1 %v938_v4  ;;  %v2060_v4 = vld [vmem:[%s2705_s2 + $0x8] ss:$12 sps:$4 sm:$0xff]  }
  0xdf   :  { %1421 = vmatprep.subr.bf16.mxu1 %v2042_v5 }
  0xe3   :  { %1047 = vmatpush1.bf16.xpose.msra.mxu0 %v1987_v63 }
  0xe4   :  { %1048 = vmatprep.subr.bf16.mxu0 %v1995_v1 }
  0xe5   :  { %1783 = vmatmul.mubr.msk.bf16.vlgmr.msra.gmra.mrb[4].mxu1 %vm879_vm0, %v2524_v8 }
  0xe6   :  { %1422 = vmatpush1.bf16.xpose.msra.mxu1 %v2040_v9  ;;  %v2061_v9 = vld [vmem:[%s2705_s2 + $0x20] ss:$12 sps:$4 sm:$0xff]  }
  0xe7   :  { %1423 = vmatprep.subr.bf16.mxu1 %v2045_v13  ;;  %v2062_v13 = vld [vmem:[%s2705_s2 + $0x38] ss:$12 sps:$4 sm:$0xff]  }
  0xeb   :  { %1049 = vmatpush1.bf16.xpose.msra.mxu0 %v1993_v3 }
  0xec   :  { %1050 = vmatprep.subr.bf16.mxu0 %v2001_v6 }
  0xee   :  { %1424 = vmatpush1.bf16.xpose.msra.mxu1 %v2043_v19  ;;  %v2063_v19 = vld [vmem:[%s2705_s2 + $0x50] ss:$12 sps:$4 sm:$0xff]  }
  0xef   :  { %1425 = vmatprep.subr.bf16.mxu1 %v2048_v15  ;;  %v2064_v15 = vld [vmem:[%s2705_s2 + $0x68] ss:$12 sps:$4 sm:$0xff]  }
  0xf3   :  { %1051 = vmatpush1.bf16.xpose.msra.mxu0 %v1999_v12  ;;  %v1404_v12 = vsel %vm1396_vm3, %v2061_v9, 0 }
  0xf4   :  { %1052 = vmatprep.subr.bf16.mxu0 %v2007_v10  ;;  %v1407_v10 = vsel %vm1396_vm3, %v2062_v13, 0 }
  0xf6   :  { %1426 = vmatpush1.bf16.xpose.msra.mxu1 %v2046_v18  ;;  %v1416_v18 = vsel %vm1396_vm3, %v2065_v17, 0 }
  0xf7   :  { %1427 = vmatprep.subr.bf16.mxu1 %v2051_v22 }
  0xfb   :  { %1053 = vmatpush1.bf16.xpose.msra.mxu0 %v2005_v14  ;;  %v1410_v14 = vsel %vm1396_vm3, %v2063_v19, 0 }
  0xfc   :  { %1836 = vmatprep.subr.msk.bf16.mxu0 %vm879_vm0, %v2012_v16  ;;  %v1413_v16 = vsel %vm1396_vm3, %v2064_v15, 0 }
  0xfe   :  { %1428 = vmatpush1.bf16.xpose.msra.mxu1 %v2049_v24 }
 0x102   :  { %1055 = vmatmul.mubr.bf16.vlgmr.msra.gmra.mrb[0].mxu0 %v2339_v11  ;;  %v2054_v11 = vld [vmem:[%s2705_s2 + $0x64] ss:$12 sps:$4 sm:$0xff]  }
 0x103   :  { %1745 = vmatpush3.bf16.xpose.msra.mxu0 %v884_v20  ;;  %1760 = vmatprep.mubr.msk.bf16.mxu0 %vm879_vm0, %v2524_v8  ;;  %v2066_v20 = vld [vmem:[%s2705_s2 + $0x98] ss:$0 sps:$4 sm:$0x33]   ;;  %s2099_s2 = smov [#allocation2]  }
 0x104   :  { %1837 = vmatprep.subr.msk.bf16.mxu0 %vm879_vm0, %v2017_v21  ;;  %1429 = vmatprep.subr.bf16.mxu1 %v2054_v11  ;;  %v1419_v21 = vsel %vm1396_vm3, %v2066_v20, 0  ;;  %s1577_s6 = sshll.u32 %s2099_s2, 4  ;;  %s1578_s6 = int_to_ptr.vmem [resolvable:$true] %s1577_s6 }
 0x105   :  { %s2072_s7 = scalar_lea.vmem %s1578_s6, 64  ;;  %p2077_p1 = scmp.lt.s32.totalorder %s1578_s6, %s1578_s6 }
 0x106   :  { %1430 = vmatpush1.bf16.xpose.msra.mxu1 %v2052_v30  ;;  %p2073_p0 = scmp.ne.s32.totalorder %s1578_s6, %s2072_s7  ;;  %p2078_p2 = scmp.lt.s32.totalorder %s2072_s7, %s2072_s7 }
 0x107   :  { %1431 = vmatprep.subr.bf16.mxu1 %v2057_v47 }
 0x108   :  { %p2079_p3 = por %p2078_p2, %p2077_p1 }
 0x10a   :  { %p2080_p4 = pnand %p2079_p3, %p2073_p0 }
 0x10b   :  { %1747 = vmatpush3.bf16.xpose.msra.mxu0 %v887_v25 }
 0x10c   :  { %1838 = vmatprep.subr.msk.bf16.mxu0 %vm879_vm0, %v2022_v28 }
 0x10e   :  { %1432 = vmatpush1.bf16.xpose.msra.mxu1 %v2055_v46 }
 0x10f   :  { %1433 = vmatprep.subr.bf16.mxu1 %v1739_v53 }
 0x113   :  { %1749 = vmatpush3.bf16.xpose.msra.mxu0 %v890_v31 }
 0x114   :  { %1839 = vmatprep.subr.msk.bf16.mxu0 %vm879_vm0, %v2027_v32 }
 0x116   :  { %1434 = vmatpush1.bf16.xpose.msra.mxu1 %v1738_v26 }
 0x117   :  { %1786 = vmatprep.subr.bf16.mxu1 %v2097_v57 }
 0x11b   :  { %1751 = vmatpush3.bf16.xpose.msra.mxu0 %v893_v34 }
 0x11c   :  { %1840 = vmatprep.subr.msk.bf16.mxu0 %vm879_vm0, %v2030_v35 }
 0x123   :  { %1753 = vmatpush3.bf16.xpose.msra.mxu0 %v896_v37 }
 0x124   :  { %1841 = vmatprep.subr.msk.bf16.mxu0 %vm879_vm0, %v2033_v38 }
 0x12b   :  { %1755 = vmatpush3.bf16.xpose.msra.mxu0 %v899_v40 }
 0x12c   :  { %1842 = vmatprep.subr.msk.bf16.mxu0 %vm879_vm0, %v2036_v41 }
 0x133   :  { %1757 = vmatpush3.bf16.xpose.msra.mxu0 %v902_v43 }
 0x134   :  { %1843 = vmatprep.subr.msk.bf16.mxu0 %vm879_vm0, %v2038_v27 }
 0x13b   :  { %1759 = vmatpush3.bf16.xpose.msra.mxu0 %v905_v45 }
 0x13c   :  { %1804 = vmatprep.subr.bf16.mxu0 %v2097_v57 }
 0x142   :  { %1761 = vmatmul.mubr.msk.bf16.vlgmr.msra.gmra.mrb[0].mxu0 %vm879_vm0, %v2524_v8  ;;  %v1401_v8 = vsel %vm1396_vm3, %v2060_v4, 0 }
 0x143   :  { %1806 = vmatprep.mubr.msk.bf16.mxu0 %vm2098_vm1, %v2097_v57  ;;  %1805 = vmatpush3.bf16.xpose.msra.mxu0 %v1515_v60 }
 0x158   :  { %v974_v48 = vpop.f32.mrb[0].mxu1 }
 0x159   :  { %v976_v49 = vpop.f32.mrb[1].mxu1 }
 0x15a   :  { %v978_v50 = vpop.f32.mrb[2].mxu1 }
 0x15b   :  { %v979_v51 = vpop.f32.mrb[3].mxu1 }
 0x1b8   :  { %v1258_v54 = vpop.f32.mrb[4].mxu1 }
 0x1b9   :  { %v1784_v55 = vpop.f32.mrb[5].mxu1  ;;  %v1266_v22 = vmax.f32 %v1258_v54, 0.0 }
 0x1ba   :  { %v1261_v56 = vpop.f32.mrb[6].mxu1 }
 0x1bb   :  { %v1785_v58 = vpop.f32.mrb[7].mxu1  ;;  %v1269_v23 = vpack.c.bf16 %v1266_v22, %v1266_v22 }
 0x215   :  { %v1097_v61 = vpop.f32.mrb[0].mxu0 }
 0x216   :  { %v1810_v62 = vadd.f32 %v1097_v61, %v974_v48  ;;  %v1099_v63 = vpop.f32.mrb[1].mxu0 }
 0x217   :  { %v1811_v0 = vadd.f32 %v1099_v63, %v976_v49  ;;  %v1101_v1 = vpop.f32.mrb[2].mxu0 }
 0x218   :  { %v1264_v2 = vmax.f32 %v1810_v62, 0.0  ;;  %v1102_v3 = vpop.f32.mrb[3].mxu0 }
 0x219   :  { %v1265_v5 = vmax.f32 %v1811_v0, 0.0 }
 0x21a   :  { %v1267_v7 = vpack.c.bf16 %v1264_v2, %v1264_v2 }
 0x21b   :  { %v1268_v6 = vpack.c.bf16 %v1265_v5, %v1265_v5 }
 0x21d   :  { %1453 = vmatprep.mubr.bf16.mxu1 %v1268_v6 }
 0x21e   :  { %1454 = vmatmul.mubr.bf16.vlgmr.msra.gmra.mrb[8].mxu1 %v1267_v7 }
 0x21f   :  { %1787 = vmatpush3.bf16.xpose.msra.mxu1 %v1401_v8  ;;  %1800 = vmatprep.mubr.msk.bf16.mxu1 %vm2098_vm1, %v2097_v57 }
 0x220   :  { %1788 = vmatprep.subr.bf16.mxu1 %v2097_v57 }
 0x227   :  { %1789 = vmatpush3.bf16.xpose.msra.mxu1 %v1404_v12 }
 0x228   :  { %1790 = vmatprep.subr.bf16.mxu1 %v2097_v57 }
 0x22f   :  { %1791 = vmatpush3.bf16.xpose.msra.mxu1 %v1407_v10 }
 0x230   :  { %1792 = vmatprep.subr.bf16.mxu1 %v2097_v57 }
 0x237   :  { %1793 = vmatpush3.bf16.xpose.msra.mxu1 %v1410_v14 }
 0x238   :  { %1794 = vmatprep.subr.bf16.mxu1 %v2097_v57 }
 0x23f   :  { %1795 = vmatpush3.bf16.xpose.msra.mxu1 %v1413_v16 }
 0x240   :  { %1796 = vmatprep.subr.bf16.mxu1 %v2097_v57 }
 0x247   :  { %1797 = vmatpush3.bf16.xpose.msra.mxu1 %v1416_v18 }
 0x248   :  { %1798 = vmatprep.subr.bf16.mxu1 %v2097_v57 }
 0x24f   :  { %1799 = vmatpush3.bf16.xpose.msra.mxu1 %v1419_v21 }
 0x256   :  { %1801 = vmatmul.mubr.msk.bf16.vlgmr.msra.gmra.mrb[8].mxu1 %vm1396_vm3, %v1269_v23 }
 0x329   :  { %v1495_v24 = vpop.f32.mrb[8].mxu1 }
 0x32a   :  { %v1501_v11 = vmax.f32 %v1495_v24, 0.0  ;;  %v1802_v25 = vpop.f32.mrb[9].mxu1 }
 0x32b   :  { %v1498_v28 = vpop.f32.mrb[10].mxu1 }
 0x32c   :  { %v1502_v29 = vpack.c.bf16 %v1501_v11, %v1501_v11  ;;  %v1803_v30 = vpop.f32.mrb[11].mxu1 }
 0x32e   :  { %1807 = vmatmul.mubr.msk.bf16.vlgmr.msra.gmra.mrb[4].mxu0 %vm1510_vm2, %v1502_v29 }
 0x401   :  { %v1551_v57 = vpop.f32.mrb[4].mxu0 }
 0x402   :  { %v1808_v31 = vpop.f32.mrb[5].mxu0  ;;  %v1558_v32 = vsel %vm1557_vm4, %v1551_v57, -inf }
 0x403   :  { %1559 = vmax.xlane.f32.xlu0 %v1558_v32  ;;  %v1554_v33 = vpop.f32.mrb[6].mxu0 }
 0x404   :  { %v1809_v34 = vpop.f32.mrb[7].mxu0 }
 0x490   :  { %v1560_v35 = vpop.xlane.xlu0 %1559 }
 0x491   :  { %v1561_v36 = vsub.f32 %v1551_v57, %v1560_v35 }
 0x493   :  { %v1562_v37 = vmul.f32 1.442695, %v1561_v36 }
 0x495   :  { %2068 = vpow2.f32 %v1562_v37 }
 0x49f   :  { %v2069_v38 = vpop.eup %2068 }
 0x4a0   :  { %v1564_v39 = vsel %vm1557_vm4, %v2069_v38, 0.0 }
 0x4a1   :  { %1565 = vadd.xlane.f32.xlu0 %v1564_v39 }
 0x52e   :  { %v1566_v40 = vpop.xlane.xlu0 %1565 }
 0x52f   :  { %2070 = vlog2.f32 %v1566_v40 }
 0x539   :  { %v2071_v41 = vpop.eup %2070 }
 0x53a   :  { %v1568_v42 = vmul.f32 0.6931472, %v2071_v41 }
 0x53c   :  { %v1569_v43 = vsub.f32 %v1561_v36, %v1568_v42 }
 0x53e   :  { %1570 = vst.msk [vmem:[#allocation2] sm:$0xf] %vm1557_vm4, %v1569_v43 }
 0x53f   :  { %2083 = shalt.err (!%p2080_p4)
}
 0x540   :  { %s2084_s10 = scalar_lea.hbm %s2707_s4, 64 }
 0x541   :  { %p2085_p5 = scmp.ne.s32.totalorder %s2707_s4, %s2084_s10  ;;  %p2088_p6 = scmp.lt.u32.totalorder %s2084_s10, %s2707_s4 }
 0x543   :  { %p2090_p7 = pnand %p2088_p6, %p2085_p5 }
 0x545   :  { %2093 = shalt.err (!%p2090_p7)
}
 0x546   :  { %1580 = dma.vmem_to_hbm [thread:$0]  %s1578_s6, 64, %s2707_s4, [#allocation3]  }
 0x547   :  { %2094 = dma.done.wait [#allocation3], 64  }
 0x548   :  { %2095 = vsyncadd [#allocation3], 4294967232 }
 0x549   :  { %1584 = vsyncpa [#allocation3], 1 }

</bundles_post_ra>
